<compile_context>
chip_gen: v5e
topology: v5e:2x2
jax: 0.10.0
libtpu: 0.0.40
codegen_flags: <defaults>
</compile_context>

<pallas_src>
import functools

import jax
import jax.numpy as jnp
from jax.experimental import pallas as pl
from jax.experimental.pallas import tpu as pltpu


def _attention_kernel(x_ref, wqkv_ref, wo_ref, o_ref, acc_ref, *,
                      approx_reciprocal):
    """One (batch-tile, head) grid step of multi-head self-attention."""
    h = pl.program_id(1)
    n_heads = pl.num_programs(1)
    Bt, N, dim = x_ref.shape
    dh = wqkv_ref.shape[-1] // 3
    rows = Bt * N

    @pl.when(h == 0)
    def _():
        acc_ref[...] = jnp.zeros_like(acc_ref)

    # (Bt, N, dim) -> (Bt*N, dim): leading-dim merge, layout preserving.
    x = x_ref[...].reshape(rows, dim)
    cdt = x.dtype                                    # MXU operand dtype

    # Fused per-head Q/K/V projection: one MXU weight push per grid step; the
    # softmax scale is already folded into the Q third of the weight (wrapper).
    qkv = jnp.dot(x, wqkv_ref[0], preferred_element_type=jnp.float32)

    q = qkv[:, 0 * dh:1 * dh].astype(cdt).reshape(Bt, N, dh)
    k = qkv[:, 1 * dh:2 * dh].astype(cdt).reshape(Bt, N, dh)
    v = qkv[:, 2 * dh:3 * dh].astype(cdt).reshape(Bt, N, dh)

    # Scores contract K on its last (lane) dim -> no explicit kh.T requested.
    dots = jnp.einsum("bnd,bmd->bnm", q, k,
                      preferred_element_type=jnp.float32)       # (Bt, N, N) f32

    # Numerically-stable softmax in f32; reciprocal runs on the EUP slot.
    m = jnp.max(dots, axis=-1, keepdims=True)
    p = jnp.exp(dots - m)
    l = jnp.sum(p, axis=-1, keepdims=True)
    inv_l = pl.reciprocal(l, approx=approx_reciprocal)
    probs = (p * inv_l).astype(cdt)

    pv = jnp.einsum("bnm,bmd->bnd", probs, v,
                    preferred_element_type=jnp.float32)          # (Bt, N, dh)

    # Per-head output projection, accumulated across the heads grid axis.
    acc_ref[...] += jnp.dot(pv.reshape(rows, dh).astype(cdt), wo_ref[0],
                            preferred_element_type=jnp.float32)

    @pl.when(h == n_heads - 1)
    def _():
        # o_ref block is either (Bt, N*dim) (lane-dense, unmasked stores) or
        # (Bt, N, dim); reshape the f32 accumulator to the requested layout.
        o_ref[...] = acc_ref[...].reshape(o_ref.shape).astype(o_ref.dtype)


def prepare_attention_weights(w_qkv, w_out, *, heads, dim_head,
                              compute_dtype=jnp.bfloat16):
    """Per-head weight slabs with the softmax scale folded into Q.

    In production call this ONCE at parameter-init time (hoisted out of the
    per-forward path, review item); attention_pallas also accepts raw fused
    weights and prepares them on the fly for convenience.
    """
    dim = w_qkv.shape[0]
    inner = heads * dim_head
    assert w_qkv.shape == (dim, 3 * inner)
    assert w_out.shape == (inner, dim)
    scale = dim_head ** (-0.5)

    wq, wk, wv = jnp.split(w_qkv, 3, axis=1)                 # (dim, inner) each

    def per_head(w):                                         # -> (heads, dim, dh)
        return w.reshape(dim, heads, dim_head).transpose(1, 0, 2)

    wqkv_h = jnp.concatenate(
        [per_head(wq * scale), per_head(wk), per_head(wv)], axis=-1)
    wo_h = w_out.reshape(heads, dim_head, dim)
    return wqkv_h.astype(compute_dtype), wo_h.astype(compute_dtype)


def _tile_bytes(r, c, itemsize):
    """Bytes of an (r, c) VMEM tile padded to the (8, 128) vreg grid."""
    return (-(-r // 8) * 8) * (-(-c // 128) * 128) * itemsize


def _estimate_step_vmem_bytes(bt, N, dim, dim_head, compute_itemsize):
    """Rough padded per-grid-step VMEM residency (review item: size vs 64 MiB)."""
    rows = bt * N
    x_io = 2 * _tile_bytes(rows, dim, compute_itemsize)             # dbl-buffered
    out_io = 2 * _tile_bytes(rows, dim, 4)                          # dbl-buffered
    w_io = 2 * (_tile_bytes(dim, 3 * dim_head, compute_itemsize)
                + _tile_bytes(dim_head, dim, compute_itemsize))     # pipelined
    acc = _tile_bytes(rows, dim, 4)                                 # f32 scratch
    interm = (_tile_bytes(rows, 3 * dim_head, 4)                    # fused qkv f32
              + 3 * _tile_bytes(rows, dim_head, compute_itemsize)   # q / k / v
              + 2 * bt * _tile_bytes(N, N, 4)                       # dots + p
              + _tile_bytes(rows, dim_head, 4))                     # pv
    return x_io + out_io + w_io + acc + interm


def _pick_block_batch(B, N, dim, dim_head, compute_itemsize, *,
                      target_rows=512, vmem_budget_bytes=48 * 1024 * 1024):
    """~target_rows rows/step (512 fills the 256-wide v6e/v7x MXU; use 256 on
    v5e), >= 4 grid steps (>= 2 per v7x TensorCore) when B allows, and a
    per-step VMEM estimate under the budget."""
    bt = max(1, min(B, -(-target_rows // N)))        # ceil(target_rows / N)
    if B >= 4:
        bt = min(bt, B // 4)
    elif B >= 2:
        bt = min(bt, B // 2)
    while B % bt:
        bt -= 1
    while bt > 1 and _estimate_step_vmem_bytes(
            bt, N, dim, dim_head, compute_itemsize) > vmem_budget_bytes:
        bt -= 1
        while B % bt:
            bt -= 1
    return max(bt, 1)


def attention_pallas(x, w_qkv, w_out, *, heads, dim_head,
                     compute_dtype=jnp.bfloat16, block_batch=None,
                     target_rows=512, vmem_limit_bytes=64 * 1024 * 1024,
                     approx_reciprocal=True, lane_dense_out=None):
    B, N, dim = x.shape
    inner = heads * dim_head
    assert w_qkv.shape == (dim, 3 * inner)
    assert w_out.shape == (inner, dim)
    out_dtype = x.dtype

    wqkv_h, wo_h = prepare_attention_weights(
        w_qkv, w_out, heads=heads, dim_head=dim_head,
        compute_dtype=compute_dtype)
    x_c = x.astype(compute_dtype)

    itemsize = jnp.dtype(compute_dtype).itemsize
    if block_batch is None:
        block_batch = _pick_block_batch(B, N, dim, dim_head, itemsize,
                                        target_rows=target_rows)
    assert B % block_batch == 0

    # Lane-dense output (unmasked vst) when dim is narrower than a 128-lane
    # vreg but a full sequence row packs to a multiple of 128 lanes.
    if lane_dense_out is None:
        lane_dense_out = (dim % 128 != 0 and (N * dim) % 128 == 0
                          and (block_batch == B or block_batch % 8 == 0))

    kernel = functools.partial(_attention_kernel,
                               approx_reciprocal=approx_reciprocal)
    grid = (B // block_batch, heads)            # heads = reduction axis, last
    in_specs = [
        pl.BlockSpec((block_batch, N, dim), lambda b, h: (b, 0, 0)),
        pl.BlockSpec((1, dim, 3 * dim_head), lambda b, h: (h, 0, 0)),
        pl.BlockSpec((1, dim_head, dim), lambda b, h: (h, 0, 0)),
    ]
    scratch_shapes = [pltpu.VMEM((block_batch * N, dim), jnp.float32)]
    compiler_params = pltpu.CompilerParams(
        dimension_semantics=("parallel", "arbitrary"),
        vmem_limit_bytes=vmem_limit_bytes,
    )

    def build(dense):
        if dense:
            out_shape = jax.ShapeDtypeStruct((B, N * dim), out_dtype)
            out_spec = pl.BlockSpec((block_batch, N * dim), lambda b, h: (b, 0))
        else:
            out_shape = jax.ShapeDtypeStruct((B, N, dim), out_dtype)
            out_spec = pl.BlockSpec((block_batch, N, dim),
                                    lambda b, h: (b, 0, 0))
        return pl.pallas_call(
            kernel,
            out_shape=out_shape,
            grid_spec=pltpu.PrefetchScalarGridSpec(
                num_scalar_prefetch=0,
                grid=grid,
                in_specs=in_specs,
                out_specs=out_spec,
                scratch_shapes=scratch_shapes,
            ),
            compiler_params=compiler_params,
        )

    if lane_dense_out:
        try:
            out = jax.block_until_ready(build(True)(x_c, wqkv_h, wo_h))
            return out.reshape(B, N, dim)        # free relayout in the wrapper
        except Exception:
            # In-kernel (rows, dim) -> (Bt, N*dim) relayout did not lower on
            # this backend; fall back to the (Bt, N, dim) block layout.
            pass
    return build(False)(x_c, wqkv_h, wo_h)


def attention_ref(x, w_qkv, w_out, *, heads, dim_head):
    """Pure-JAX reference mirroring the PyTorch forward."""
    B, N, dim = x.shape
    inner = heads * dim_head
    scale = dim_head ** (-0.5)
    qkv = x @ w_qkv                                              # (B, N, 3*inner)
    q, k, v = jnp.split(qkv, 3, axis=-1)

    def split_heads(t):  # 'b n (h d) -> b h n d'
        return t.reshape(B, N, heads, dim_head).transpose(0, 2, 1, 3)

    q, k, v = map(split_heads, (q, k, v))
    dots = jnp.einsum("bhnd,bhmd->bhnm", q, k) * scale
    attn = jax.nn.softmax(dots, axis=-1)
    out = jnp.einsum("bhnm,bhmd->bhnd", attn, v)
    out = out.transpose(0, 2, 1, 3).reshape(B, N, inner)         # 'b h n d -> b n (h d)'
    return out @ w_out


if __name__ == "__main__":
    # Small shapes consistent with the module: dim=32, heads=4, dim_head=8.
    B, N, dim = 2, 8, 32
    heads, dim_head = 4, 8
    inner = heads * dim_head

    key = jax.random.PRNGKey(0)
    kx, kq, ko = jax.random.split(key, 3)
    x = jax.random.normal(kx, (B, N, dim), dtype=jnp.float32)
    # Deterministic parameter init (Linear weights, bias=False), pre-transposed.
    w_qkv = jax.random.normal(kq, (dim, 3 * inner), dtype=jnp.float32) * (dim ** -0.5)
    w_out = jax.random.normal(ko, (inner, dim), dtype=jnp.float32) * (inner ** -0.5)

    ref = attention_ref(x, w_qkv, w_out, heads=heads, dim_head=dim_head)

    # 1) f32 MXU operands, exact reciprocal, auto batch tiling (2 grid steps on
    #    the "parallel" batch axis, heads on the "arbitrary" axis).
    out_f32 = jax.block_until_ready(attention_pallas(
        x, w_qkv, w_out, heads=heads, dim_head=dim_head,
        compute_dtype=jnp.float32, approx_reciprocal=False))
    assert out_f32.shape == ref.shape
    assert jnp.allclose(out_f32, ref, atol=2e-2, rtol=2e-2), "f32 kernel mismatch"

    # 2) full-batch tile -> exercises the lane-dense (B, N*dim) output path
    #    (with the automatic fallback if that relayout does not lower).
    out_dense = jax.block_until_ready(attention_pallas(
        x, w_qkv, w_out, heads=heads, dim_head=dim_head,
        compute_dtype=jnp.float32, block_batch=B))
    assert jnp.allclose(out_dense, ref, atol=2e-2, rtol=2e-2), "dense-out mismatch"

    # 3) bf16 MXU operands (native on v5e/v6e/v7x); f32 accumulation + softmax.
    out_bf16 = jax.block_until_ready(attention_pallas(
        x, w_qkv, w_out, heads=heads, dim_head=dim_head,
        compute_dtype=jnp.bfloat16))
    assert jnp.allclose(out_bf16, ref, atol=5e-2, rtol=5e-2), "bf16 kernel mismatch"

    print("KERNEL_OK")
</pallas_src>

<mosaic_0001>
module attributes {stable_mosaic.version = 11 : i64} {
  func.func @_attention_kernel(%arg0: i32, %arg1: i32, %arg2: memref<1x8x32xf32, #tpu.memory_space<vmem>>, %arg3: memref<1x32x24xf32, #tpu.memory_space<vmem>>, %arg4: memref<1x8x32xf32, #tpu.memory_space<vmem>>, %arg5: memref<1x8x32xf32, #tpu.memory_space<vmem>>, %arg6: memref<8x32xf32, #tpu.memory_space<vmem>>) attributes {dimension_semantics = [#tpu.dimension_semantics<parallel>, #tpu.dimension_semantics<arbitrary>], iteration_bounds = array<i64: 2, 4>, scalar_prefetch = 0 : i64, scratch_operands = 1 : i64, tpu.core_type = #tpu.core_type<tc>, window_params = [{transform_indices = @transform_0, window_bounds = array<i64: 1, 8, 32>}, {transform_indices = @transform_1, window_bounds = array<i64: 1, 32, 24>}, {transform_indices = @transform_2, window_bounds = array<i64: 1, 8, 32>}, {transform_indices = @transform_3, window_bounds = array<i64: 1, 8, 32>}]} {
    %c0_i32 = arith.constant 0 : i32
    %0 = arith.cmpi eq, %arg1, %c0_i32 : i32
    %1 = arith.extui %0 : i1 to i32
    %c0_i32_0 = arith.constant 0 : i32
    %2 = arith.cmpi ne, %1, %c0_i32_0 : i32
    scf.if %2 {
      %cst_19 = arith.constant 0.000000e+00 : f32
      %36 = vector.broadcast %cst_19 : f32 to vector<8x32xf32>
      %c0_20 = arith.constant 0 : index
      %c0_21 = arith.constant 0 : index
      %37 = vector.load %arg6[%c0_20, %c0_21] : memref<8x32xf32, #tpu.memory_space<vmem>>, vector<8x32xf32>
      tpu.vector_store %arg6[%c0_20, %c0_21], %36 {strides = array<i32>} : memref<8x32xf32, #tpu.memory_space<vmem>>, vector<8x32xf32>,
    } else {
    }
    %c0 = arith.constant 0 : index
    %c0_1 = arith.constant 0 : index
    %c0_2 = arith.constant 0 : index
    %3 = vector.load %arg2[%c0, %c0_1, %c0_2] : memref<1x8x32xf32, #tpu.memory_space<vmem>>, vector<1x8x32xf32>
    %4 = vector.shape_cast %3 : vector<1x8x32xf32> to vector<8x32xf32>
    %c0_3 = arith.constant 0 : index
    %c0_4 = arith.constant 0 : index
    %c0_5 = arith.constant 0 : index
    %5 = vector.load %arg3[%c0_3, %c0_4, %c0_5] : memref<1x32x24xf32, #tpu.memory_space<vmem>>, vector<1x32x24xf32>
    %6 = vector.shape_cast %5 : vector<1x32x24xf32> to vector<32x24xf32>
    %cst = arith.constant dense<0.000000e+00> : vector<8x24xf32>
    %7 = tpu.matmul %4, %6, %cst {dimension_numbers = #tpu.dot_dimension_numbers<[1], [0], [0], [1], [0, 0, 1, 1], [], []>} : vector<8x32xf32>, vector<32x24xf32>, vector<8x24xf32> -> vector<8x24xf32>
    %8 = vector.extract_strided_slice %7 {offsets = [0, 0], sizes = [8, 8], strides = [1, 1]} : vector<8x24xf32> to vector<8x8xf32>
    %9 = vector.shape_cast %8 : vector<8x8xf32> to vector<1x8x8xf32>
    %10 = vector.extract_strided_slice %7 {offsets = [0, 8], sizes = [8, 8], strides = [1, 1]} : vector<8x24xf32> to vector<8x8xf32>
    %11 = vector.shape_cast %10 : vector<8x8xf32> to vector<1x8x8xf32>
    %12 = vector.extract_strided_slice %7 {offsets = [0, 16], sizes = [8, 8], strides = [1, 1]} : vector<8x24xf32> to vector<8x8xf32>
    %13 = vector.shape_cast %12 : vector<8x8xf32> to vector<1x8x8xf32>
    "tpu.trace_start"() <{level = 10 : i32, message = "bnd,bmd->bnm"}> : () -> ()
    %cst_6 = arith.constant dense<0.000000e+00> : vector<1x8x8xf32>
    %14 = tpu.matmul %9, %11, %cst_6 {dimension_numbers = #tpu.dot_dimension_numbers<[2], [2], [1], [1], [0, 0, 0, 1, 1, 1], [0], [0]>} : vector<1x8x8xf32>, vector<1x8x8xf32>, vector<1x8x8xf32> -> vector<1x8x8xf32>
    "tpu.trace_stop"() : () -> ()
    %cst_7 = arith.constant dense<0xFF800000> : vector<1x8xf32>
    %15 = vector.multi_reduction <maximumf>, %14, %cst_7 [2] : vector<1x8x8xf32> to vector<1x8xf32>
    %16 = vector.shape_cast %15 : vector<1x8xf32> to vector<1x8x1xf32>
    %17 = vector.broadcast %16 : vector<1x8x1xf32> to vector<1x8x8xf32>
    %18 = arith.subf %14, %17 : vector<1x8x8xf32>
    %19 = math.exp %18 : vector<1x8x8xf32>
    %cst_8 = arith.constant dense<0.000000e+00> : vector<1x8xf32>
    %20 = vector.multi_reduction <add>, %19, %cst_8 [2] : vector<1x8x8xf32> to vector<1x8xf32>
    %21 = vector.shape_cast %20 : vector<1x8xf32> to vector<1x8x1xf32>
    %22 = tpu.reciprocal %21 : vector<1x8x1xf32> -> vector<1x8x1xf32>
    %23 = vector.broadcast %22 : vector<1x8x1xf32> to vector<1x8x8xf32>
    %24 = arith.mulf %19, %23 : vector<1x8x8xf32>
    "tpu.trace_start"() <{level = 10 : i32, message = "bnm,bmd->bnd"}> : () -> ()
    %cst_9 = arith.constant dense<0.000000e+00> : vector<1x8x8xf32>
    %25 = tpu.matmul %24, %13, %cst_9 {dimension_numbers = #tpu.dot_dimension_numbers<[2], [1], [1], [2], [0, 0, 0, 1, 1, 2], [0], [0]>} : vector<1x8x8xf32>, vector<1x8x8xf32>, vector<1x8x8xf32> -> vector<1x8x8xf32>
    "tpu.trace_stop"() : () -> ()
    %c0_10 = arith.constant 0 : index
    %c0_11 = arith.constant 0 : index
    %26 = vector.load %arg6[%c0_10, %c0_11] : memref<8x32xf32, #tpu.memory_space<vmem>>, vector<8x32xf32>
    %27 = vector.shape_cast %25 : vector<1x8x8xf32> to vector<8x8xf32>
    %c0_12 = arith.constant 0 : index
    %c0_13 = arith.constant 0 : index
    %c0_14 = arith.constant 0 : index
    %28 = vector.load %arg4[%c0_12, %c0_13, %c0_14] : memref<1x8x32xf32, #tpu.memory_space<vmem>>, vector<1x8x32xf32>
    %29 = vector.shape_cast %28 : vector<1x8x32xf32> to vector<8x32xf32>
    %cst_15 = arith.constant dense<0.000000e+00> : vector<8x32xf32>
    %30 = tpu.matmul %27, %29, %cst_15 {dimension_numbers = #tpu.dot_dimension_numbers<[1], [0], [0], [1], [0, 0, 1, 1], [], []>} : vector<8x8xf32>, vector<8x32xf32>, vector<8x32xf32> -> vector<8x32xf32>
    %31 = arith.addf %26, %30 : vector<8x32xf32>
    %c0_16 = arith.constant 0 : index
    %c0_17 = arith.constant 0 : index
    %32 = vector.load %arg6[%c0_16, %c0_17] : memref<8x32xf32, #tpu.memory_space<vmem>>, vector<8x32xf32>
    tpu.vector_store %arg6[%c0_16, %c0_17], %31 {strides = array<i32>} : memref<8x32xf32, #tpu.memory_space<vmem>>, vector<8x32xf32>,
    %c3_i32 = arith.constant 3 : i32
    %33 = arith.cmpi eq, %arg1, %c3_i32 : i32
    %34 = arith.extui %33 : i1 to i32
    %c0_i32_18 = arith.constant 0 : i32
    %35 = arith.cmpi ne, %34, %c0_i32_18 : i32
    scf.if %35 {
      %c0_19 = arith.constant 0 : index
      %c0_20 = arith.constant 0 : index
      %36 = vector.load %arg6[%c0_19, %c0_20] : memref<8x32xf32, #tpu.memory_space<vmem>>, vector<8x32xf32>
      %37 = vector.shape_cast %36 : vector<8x32xf32> to vector<1x8x32xf32>
      %c0_21 = arith.constant 0 : index
      %c0_22 = arith.constant 0 : index
      %c0_23 = arith.constant 0 : index
      %38 = vector.load %arg5[%c0_21, %c0_22, %c0_23] : memref<1x8x32xf32, #tpu.memory_space<vmem>>, vector<1x8x32xf32>
      tpu.vector_store %arg5[%c0_21, %c0_22, %c0_23], %37 {strides = array<i32>} : memref<1x8x32xf32, #tpu.memory_space<vmem>>, vector<1x8x32xf32>,
    } else {
    }
    return
  }
  func.func @transform_0(%arg0: i32, %arg1: i32) -> (i32, i32, i32) {
    %c0_i32 = arith.constant 0 : i32
    %c0_i32_0 = arith.constant 0 : i32
    %c0_i32_1 = arith.constant 0 : i32
    return %arg0, %c0_i32, %c0_i32_0 : i32, i32, i32
  }
  func.func @transform_1(%arg0: i32, %arg1: i32) -> (i32, i32, i32) {
    %c0_i32 = arith.constant 0 : i32
    %c0_i32_0 = arith.constant 0 : i32
    %c0_i32_1 = arith.constant 0 : i32
    return %arg1, %c0_i32, %c0_i32_0 : i32, i32, i32
  }
  func.func @transform_2(%arg0: i32, %arg1: i32) -> (i32, i32, i32) {
    %c0_i32 = arith.constant 0 : i32
    %c0_i32_0 = arith.constant 0 : i32
    %c0_i32_1 = arith.constant 0 : i32
    return %arg1, %c0_i32, %c0_i32_0 : i32, i32, i32
  }
  func.func @transform_3(%arg0: i32, %arg1: i32) -> (i32, i32, i32) {
    %c0_i32 = arith.constant 0 : i32
    %c0_i32_0 = arith.constant 0 : i32
    %c0_i32_1 = arith.constant 0 : i32
    return %arg0, %c0_i32, %c0_i32_0 : i32, i32, i32
  }
}

</mosaic_0001>

<bundles_post_ra>
// kernel: tpu_custom_call.1
= control target key start
LH: loop header
LB: loop body
LE: loop exit
PB: predicated region body
PF: predicated region fallthrough
CT: control target
= control target key end

     0   :  { %8 = vsyncpa [#allocation4], 0  ;;  %s840_s0 = inlined_call_operand.vmem [shape: f32[2,8,32], index: 0, kind: input, shape index: {}]   ;;  %s841_s1 = inlined_call_operand.vmem [shape: f32[4,32,24], index: 1, kind: input, shape index: {}]   ;;  %s842_s2 = inlined_call_operand.vmem [shape: f32[4,8,32], index: 2, kind: input, shape index: {}]   ;;  %s843_s3 = inlined_call_operand.hbm [shape: f32[2,8,32], index: 3, kind: output, shape index: {}]  }
   0x1   :  { %10 = vsyncpa [#allocation4 + $0x1], 0  ;;  %s690_s12 = smov 0   ;;  %s692_s13 = smov 0  }
   0x2   :  { %s694_s14 = smov 0   ;;  %s696_s15 = smov 0  }
   0x3   :  { %s698_s16 = smov 0   ;;  %s700_s17 = smov 0  }
   0x4   :  { %s702_s18 = smov 0   ;;  %s704_s19 = smov 0  }
   0x5 LB: > { %s471_s20 = sadd.s32 4294967295, %s665_s19   ;;  %s472_s21 = sadd.s32 4294967294, %s665_s19   ;;  %s665_s19 = sphi %s704_s19, %s16_s19   ;;  %s661_s18 = sphi %s702_s18, %s859_s18   ;;  %s657_s17 = sphi %s700_s17, %s858_s17   ;;  %s653_s16 = sphi %s698_s16, %s857_s16   ;;  %s649_s15 = sphi %s696_s15, %s856_s15   ;;  %s645_s14 = sphi %s694_s14, %s855_s14   ;;  %s641_s13 = sphi %s692_s13, %s854_s13   ;;  %s637_s12 = sphi %s690_s12, %s853_s12  }
   0x6   : > { %s25_s22 = sadd.s32 1, %s657_s17  ;;  %s28_s23 = sadd.s32 1, %s661_s18 }
   0x7   : > { %p26_p0 = scmp.ge.s32.totalorder %s25_s22, 4  ;;  %p123_p1 = scmp.ne.s32.totalorder %s645_s14, %s641_s13 }
   0x8   : > { %p124_p2 = scmp.eq.s32.totalorder %s471_s20, 7  ;;  %p129_p4 = scmp.ne.s32.totalorder %s641_s13, %s637_s12 }
   0x9   : > { %s861_s22 = smov (%p26_p0, %s25_s22), 0  ;;  %s863_s23 = smov (!%p26_p0, %s28_s23), %s661_s18 }
   0xa   : > { %846 = sst [smem:[#allocation6_spill]] %s861_s22  ;;  %p739_p3 = por %p124_p2, %p123_p1 }
   0xb   : > { %p30_p5 = scmp.ge.s32.totalorder %s863_s23, 2  ;;  %p130_p6 = scmp.eq.s32.totalorder %s472_s21, 7 }
   0xc   : > { %p475_p7 = scmp.ge.s32.totalorder %s665_s19, 1  ;;  %p170_p8 = scmp.lt.s32.totalorder %s665_s19, 9 }
   0xd   : > { %s865_s23 = smov (%p30_p5, %s863_s23), 0  ;;  %p749_p9 = por %p130_p6, %p129_p4 }
   0xe   : > { %848 = sst [smem:[#allocation7_spill]] %s865_s23  ;;  %p171_p10 = pnand %p475_p7, %p170_p8 }
   0xf   : > { %s110_s26 = ssub.s32 %s661_s18, %s865_s23  ;;  %s113_s27 = sadd.s32 1, %s645_s14 }
  0x10   : > { %p111_p11 = scmp.eq.s32.totalorder %s110_s26, 0  ;;  %174 = sbr.rel (%p171_p10) target bundleno = 968 (0x3c8), region = 32 }
  0x11   : > { %s845_s29 = sand.u32 (!%p171_p10), 1, %s641_s13   ;;  %p202_p12 = scmp.lt.s32.totalorder (!%p171_p10), %s653_s16, 1 }
  0x12   : > { %s757_s28 = scalar_select %p111_p11, %s645_s14, %s113_s27  }
  0x13   : > { %s763_s30 = sshll.u32 (!%p171_p10), %s845_s29, 3  ;;  %p206_p13 = scmp.lt.s32.totalorder (!%p171_p10), %s649_s15, 3 }
  0x14   : > { %s201_s22 = scalar_lea.vmem (!%p171_p10), [#allocation3], %s763_s30  ;;  %p481_p0 = scmp.ne.s32.totalorder (!%p171_p10), %s649_s15, 0 }
  0x15   : > { %s203_s4 = scalar_select %p202_p12, %s653_s16, 1 }
  0x16   : > { %s207_s5 = scalar_select %p206_p13, %s649_s15, 3 }
  0x17   : > { %s477_s6 = sshll.u32 %s203_s4, 3  ;;  %218 = sbr.rel (%p481_p0) target bundleno = 30 (0x1e), region = 36 }
  0x18   : > { %s205_s9 = scalar_lea.vmem %s840_s0, %s477_s6  ;;  %s492_s10 = sshll.u32 %s207_s5, 5 }
  0x19   : > { %s210_s21 = scalar_lea.vmem %s841_s1, %s492_s10  ;;  %s480_s26 = sshll.u32 %s207_s5, 3 }
  0x1a   : > { %s777_s29 = scalar_lea.vmem %s842_s2, %s480_s26 }
  0x1c   : > { %vm219_vm0 = vcmask 261120   ;;  %v667_v0 = vmov 0.0  }
  0x1d   : > { %220 = vst.msk [vmem:[#allocation2] sm:$0xff] %vm219_vm0, %v667_v0 }
  0x1e PF: > { %v225_v1 = vld [vmem:[%s210_s21 + $0x18] sm:$0xff]  ;;  %v224_v2 = vld [vmem:[%s210_s21 + $0x10] sm:$0xff]  ;;  %v223_v3 = vld [vmem:[%s210_s21 + $0x8] sm:$0xff]  ;;  %vm226_vm1 = vcmask 261120   ;;  %s668_s23 = smov 120   ;;  %vm253_vm2 = vcmask 64512  }
  0x1f   : > { %242 = vmatpush.msra.mxu0 %v225_v1  ;;  %v222_v4 = vld [vmem:[%s210_s21] sm:$0xff]  ;;  %s669_s4 = smov 112   ;;  %p487_p1 = scmp.ne.s32.totalorder %s649_s15, 3 }
  0x20   : > { %v221_v5 = vld [vmem:[%s205_s9] sm:$0xff] }
  0x21   : > { %243 = vmatpush.msra.mxu0 %v224_v2  ;;  %v329_v28 = vld [vmem:[%s777_s29] sm:$0xff] }
  0x22   : > { %348 = vmatpush.msra.mxu3 %v329_v28 }
  0x23   : > { %244 = vmatpush.msra.mxu0 %v223_v3 }
  0x24   : > { %v328_v30 = vld [vmem:[#allocation2] sm:$0xff] }
  0x25   : > { %245 = vmatpush.msra.mxu0 %v222_v4 }
  0x26   : > { %482 = vmatmul.msk.f32.vlgmr.msra.gmra.mxu0 %vm226_vm1, %v221_v5 }
  0xa3   : > { %v247_v6 = vpop.f32.mrf.mxu0 }
  0xa4   : > { %251 = vrot.lane.b32.xlu0 %v247_v6, %s668_s23 }
 0x116   : > { %v252_v7 = vpop.permute.xlu0 %251 }
 0x117   : > { %483 = vmatpush.xpose.msk.msra.mxu1 %vm253_vm2, %v252_v7 }
 0x11a   : > { %484 = vmatmul.msk.f32.vlgmr.msra.gmra.mxu1 %vm253_vm2, %v247_v6 }
 0x197   : > { %v275_v8 = vpop.f32.mrf.mxu1 }
 0x198   : > { %v278_v9 = vsel %vm253_vm2, %v275_v8, -inf }
 0x199   : > { %279 = vmax.xlane.f32.xlu0 %v278_v9 }
 0x20c   : > { %v280_v10 = vpop.xlane.xlu0 %279 }
 0x20d   : > { %v281_v11 = vsub.f32 %v275_v8, %v280_v10 }
 0x20f   : > { %v282_v12 = vmul.f32 1.442695, %v281_v11 }
 0x211   : > { %567 = vpow2.f32 %v282_v12 }
 0x217   : > { %v568_v13 = vpop.eup %567 }
 0x218   : > { %v284_v14 = vsel %vm253_vm2, %v568_v13, 0.0 }
 0x219   : > { %285 = vadd.xlane.f32.xlu1 %v284_v14 }
 0x232   : > { %302 = vrot.lane.b32.xlu1 %v247_v6, %s669_s4 }
 0x28c   : > { %v286_v15 = vpop.xlane.xlu1 %285 }
 0x28d   : > { %569 = vrcp.f32 %v286_v15  ;;  %v298_v21 = vand.u32 2147483648, %v286_v15  ;;  %vm292_vm4 = vweird.f32 %v286_v15  ;;  %v296_v22 = vand.u32 2147483647, %v286_v15 }
 0x28f   : > { %v299_v24 = vor.u32 1.1754944e-38, %v298_v21  ;;  %vm297_vm6 = vcmp.eq.f32.partialorder %v296_v22, 8.507059e+37 }
 0x293   : > { %v570_v16 = vpop.eup %569 }
 0x294   : > { %v288_v17 = vmul.f32 %v570_v16, %v286_v15  ;;  %vm293_vm3 = vweird.f32 %v570_v16 }
 0x295   : > { %vm294_vm5 = vmor %vm292_vm4, %vm293_vm3 }
 0x296   : > { %v289_v18 = vsub.f32 1.0, %v288_v17 }
 0x298   : > { %v290_v19 = vmul.f32 %v570_v16, %v289_v18 }
 0x29a   : > { %v291_v20 = vadd.f32 %v570_v16, %v290_v19 }
 0x29c   : > { %v295_v23 = vsel %vm294_vm5, %v570_v16, %v291_v20 }
 0x29d   : > { %v300_v25 = vsel %vm297_vm6, %v299_v24, %v295_v23 }
 0x29e   : > { %v301_v27 = vmul.f32 %v568_v13, %v300_v25 }
 0x2a4   : > { %v303_v26 = vpop.permute.xlu1 %302 }
 0x2a5   : > { %323 = vmatpush.msra.mxu2 %v303_v26 }
 0x2a6   : > { %485 = vmatmul.msk.f32.vlgmr.msra.gmra.mxu2 %vm253_vm2, %v301_v27 }
 0x329   : > { %v325_v29 = vpop.f32.mrf.mxu2 }
 0x32a   : > { %486 = vmatmul.msk.f32.vlgmr.msra.gmra.mxu3 %vm253_vm2, %v325_v29 }
 0x3ac   : > { %358 = sbr.rel (%p487_p1) target bundleno = 953 (0x3b9), region = 40 }
 0x3ad   : > { %v350_v31 = vpop.f32.mrf.mxu3 }
 0x3ae   : > { %v353_v32 = vadd.f32 %v350_v31, %v328_v30 }
 0x3b0   : > { %354 = vst.msk [vmem:[#allocation2] sm:$0xff] %vm226_vm1, %v353_v32 }
 0x3b7   : > { %v359_v33 = vld [vmem:[#allocation2] sm:$0xff] }
 0x3b8   : > { %360 = vst.msk [vmem:[%s201_s22] sm:$0xff] %vm226_vm1, %v359_v33 }
 0x3b9 PF: > { %s489_s29 = sshll.u32 %s653_s16, 3  ;;  %s374_s8 = sshll.u32 %s201_s22, 4  ;;  %s375_s8 = int_to_ptr.vmem [resolvable:$true] %s374_s8 }
 0x3ba   : > { %s372_s7 = scalar_lea.hbm %s843_s3, %s489_s29  ;;  %s850_s9 = sand.u32 1, %s641_s13  }
 0x3bb   : > { %s376_s15 = sshll.u32 %s372_s7, 4  ;;  %s362_s10 = scalar_lea.sflag [#allocation4], %s850_s9  ;;  %s377_s15 = int_to_ptr.hbm [resolvable:$true] %s376_s15 }
 0x3bc   : > { %s585_s11 = sshra.s32 %s377_s15, 4  ;;  %s591_s26 = scalar_lea.hbm %s843_s3, 16  ;;  %s586_s11 = int_to_ptr.hbm [resolvable:$true] %s585_s11 }
 0x3bd   : > { %s587_s20 = scalar_lea.hbm %s586_s11, 8  ;;  %p592_p6 = scmp.lt.s32.totalorder %s586_s11, %s843_s3 }
 0x3be   : > { %p588_p2 = scmp.ne.s32.totalorder %s586_s11, %s587_s20  ;;  %p593_p7 = scmp.lt.s32.totalorder %s591_s26, %s587_s20 }
 0x3c0   : > { %p589_p4 = pnand %p588_p2, %p739_p3  ;;  %p594_p8 = por %p593_p7, %p592_p6 }
 0x3c2   : > { %p590_p5 = pneg %p589_p4 }
 0x3c4   : > { %p595_p10 = pnand %p594_p8, %p590_p5 }
 0x3c6   : > { %598 = shalt.err (!%p595_p10)
}
 0x3c7   : > { %493 = dma.vmem_to_hbm [thread:$0]  (%p739_p3), %s375_s8, 128, %s377_s15, %s362_s10  }
 0x3c8 PF: > { %p499_p11 = scmp.ge.s32.totalorder %s665_s19, 2  ;;  %s388_s22 = sand.u32 1, %s637_s12  }
 0x3c9   : > { %s389_s30 = scalar_lea.sflag [#allocation4], %s388_s22 }
 0x3ca   : > { %p496_p12 = pnand %p499_p11, %p749_p9 }
 0x3cc   : > { %p497_p13 = pneg %p496_p12 }
 0x3ce   : > { %632 = dma.done.wait (%p497_p13), %s389_s30, 128  }
 0x3cf   : > { %634 = vsyncadd (%p497_p13), %s389_s30, 4294967168  ;;  %s16_s19 = sadd.s32 1, %s665_s19   ;;  %s851_s24 = sld [smem:[#allocation6_spill]] }
 0x3d0   : > { %p13_p0 = scmp.ge.s32.totalorder %s16_s19, 10   ;;  %s852_s4 = sld [smem:[#allocation7_spill]] }
 0x3d1   : > { %s853_s12 = smov %s641_s13  ;;  %s854_s13 = smov %s645_s14 }
 0x3d2   : > { %s855_s14 = smov %s757_s28  ;;  %s856_s15 = smov %s657_s17 }
 0x3d3   : > { %s857_s16 = smov %s661_s18  ;;  %15 = sbr.rel (!%p13_p0) target bundleno = 5 (0x5), region = 81 }
 0x3d5   : > { %s858_s17 = smov %s851_s24 }
 0x3d6   : > { %s859_s18 = smov %s852_s4 }
 0x3d8   :  { %395 = vsyncpa [#allocation4], 1 }
 0x3d9   :  { %397 = vsyncpa [#allocation4 + $0x1], 1 }

</bundles_post_ra>
